<compile_context>
chip_gen: v5e
topology: v5e:2x2
jax: 0.10.0
libtpu: 0.0.40
codegen_flags: <defaults>
</compile_context>

<pallas_src>
import functools

import jax
import jax.numpy as jnp
from jax.experimental import pallas as pl
from jax.experimental.pallas import tpu as pltpu


# ----------------------------------------------------------------------------
# Kernels
# ----------------------------------------------------------------------------
def _mean_kernel(x_ref, o_ref, *, inv_t):
    # x_ref: (Bn, T, C) VMEM tile ; o_ref: (Bn, C) lane/sublane-dense tile.
    s = jnp.sum(x_ref[...].astype(jnp.float32), axis=1)      # f32 accumulate (VPU)
    o_ref[...] = (s * inv_t).astype(o_ref.dtype)             # constant scale


def _cluster_kernel(x_ref, inv_ref, o_ref):
    # inv_ref: (Bn, 1) per-batch reciprocal of the divisor.
    s = jnp.sum(x_ref[...].astype(jnp.float32), axis=1)      # (Bn, C)
    o_ref[...] = (s * inv_ref[...]).astype(o_ref.dtype)      # broadcast over lanes


# ----------------------------------------------------------------------------
# Block sizing
# ----------------------------------------------------------------------------
def _round_up(v, m):
    return ((v + m - 1) // m) * m


def _sublane_tile(itemsize):
    # Minimal sublane tile per element width: f32 -> 8, bf16 -> 16, int8/fp8 -> 32.
    return {4: 8, 2: 16, 1: 32}.get(itemsize, 8)


def _chip_budget():
    """Return (target input-block bytes, scoped VMEM limit bytes) per chip class."""
    vmem_cap = None
    try:
        info = pltpu.get_tpu_info()
        vmem_cap = getattr(info, "vmem_capacity_bytes", None)
    except Exception:
        vmem_cap = None
    if vmem_cap is not None and vmem_cap > (64 << 20):
        # v5e / v6e class: 128 MiB physical VMEM -> generous blocks.
        return 8 << 20, 48 << 20
    # v7x class (or unknown, be conservative about the limit): 64 MiB physical
    # VMEM but ~3.2 TB/s HBM, so use big blocks under a tighter scoped limit.
    return 12 << 20, 40 << 20


def _pick_block_n(n, t, c, in_itemsize, out_itemsize, has_inv,
                  target_bytes, vmem_limit_bytes):
    """Batch rows per grid step, using *padded* VMEM tile sizes."""
    c_pad = _round_up(c, 128)                            # lane axis
    t_pad = _round_up(t, _sublane_tile(in_itemsize))     # sublane axis of 3-D tile
    in_row = t_pad * c_pad * in_itemsize                 # input bytes / batch row
    out_row = _round_up(c, 128) * out_itemsize           # (Bn, C) output bytes / row
    inv_row = 128 * 4 if has_inv else 0                  # (Bn, 1) f32 pads to 128 lanes

    # Target the input-block size, but clamp so the full double-buffered
    # footprint (2x input + 2x output + 2x inv) stays inside ~75% of the
    # scoped VMEM limit.
    bn = max(1, target_bytes // in_row)
    per_row_db = 2 * (in_row + out_row + inv_row)
    bn_cap = max(1, int(0.75 * vmem_limit_bytes) // per_row_db)
    bn = min(bn, bn_cap)

    if bn >= n:
        # Split into >=2 'parallel' grid steps when there is enough work so
        # both TensorCores stream on v7x (free on 1-TC v5e/v6e).  Blocks must
        # stay 8-aligned on the output sublane axis, so only when n >= 16.
        if n >= 16 and n * in_row >= (4 << 20):
            half = _round_up(pl.cdiv(n, 2), 8)
            if half < n:
                return half
        return n                      # full-extent block is always layout-legal

    bn = max(8, (bn // 8) * 8)        # partial coverage: keep sublane-aligned
    return min(bn, n)


# ----------------------------------------------------------------------------
# Wrapper
# ----------------------------------------------------------------------------
def segment_consensus(x, consensus_type="avg", cluster_set=None,
                      block_n=None, dim=1):
    """Pallas implementation of SegmentConsensus.forward (dim=1)."""
    if consensus_type in ("identity", "rnn"):
        return x
    if consensus_type != "avg":
        return None                    # matches the PyTorch reference
    assert dim == 1, "Pallas kernel implemented for dim=1 (segment axis)"

    N, T, C = x.shape
    itemsize = jnp.dtype(x.dtype).itemsize
    target_bytes, vmem_limit = _chip_budget()
    has_inv = cluster_set is not None

    if block_n is None:
        block_n = _pick_block_n(N, T, C, itemsize, itemsize, has_inv,
                                target_bytes, vmem_limit)
    grid = (pl.cdiv(N, block_n),)

    cost = pl.CostEstimate(
        flops=N * T * C,
        transcendentals=0,
        bytes_accessed=(N * T * C + N * C) * itemsize,
    )
    cparams = pltpu.CompilerParams(
        dimension_semantics=("parallel",),
        vmem_limit_bytes=vmem_limit,
    )

    if has_inv:
        # Per-batch divisor reciprocal, computed once in XLA.  Zeros in
        # cluster_set produce inf/NaN, same hazard as the PyTorch reference.
        inv = 1.0 / cluster_set.reshape(N, 1).astype(jnp.float32)
        out2d = pl.pallas_call(
            _cluster_kernel,
            out_shape=jax.ShapeDtypeStruct((N, C), x.dtype),
            grid_spec=pltpu.PrefetchScalarGridSpec(
                num_scalar_prefetch=0,
                grid=grid,
                in_specs=[
                    pl.BlockSpec((block_n, T, C), lambda i: (i, 0, 0)),
                    pl.BlockSpec((block_n, 1), lambda i: (i, 0)),
                ],
                out_specs=pl.BlockSpec((block_n, C), lambda i: (i, 0)),
            ),
            compiler_params=cparams,
            cost_estimate=cost,
        )(x, inv)
    else:
        kernel = functools.partial(_mean_kernel, inv_t=1.0 / float(T))
        out2d = pl.pallas_call(
            kernel,
            out_shape=jax.ShapeDtypeStruct((N, C), x.dtype),
            grid_spec=pltpu.PrefetchScalarGridSpec(
                num_scalar_prefetch=0,
                grid=grid,
                in_specs=[pl.BlockSpec((block_n, T, C), lambda i: (i, 0, 0))],
                out_specs=pl.BlockSpec((block_n, C), lambda i: (i, 0)),
            ),
            compiler_params=cparams,
            cost_estimate=cost,
        )(x)

    # keepdim=True semantics: (N, C) -> (N, 1, C), free metadata reshape.
    return out2d.reshape(N, 1, C)


class ConsensusModule:
    """JAX/Pallas port of the PyTorch ConsensusModule."""

    def __init__(self, consensus_type, dim=1):
        self.consensus_type = consensus_type if consensus_type != "rnn" else "identity"
        self.dim = dim
        assert dim == 1, "Pallas kernel implemented for dim=1 (segment axis)"

    def __call__(self, x, cluster_set=None):
        return segment_consensus(x, self.consensus_type,
                                 cluster_set=cluster_set, dim=self.dim)


if __name__ == "__main__":
    key = jax.random.PRNGKey(0)
    k1, k2, k3 = jax.random.split(key, 3)

    # --- small canonical shapes: batch=2, num_segments=8, num_classes=32 ---
    N, T, C = 2, 8, 32
    x = jax.random.normal(k1, (N, T, C), dtype=jnp.float32)
    cluster_set = (jax.random.randint(k2, (N, 1), 1, 5)).astype(jnp.float32)

    # 'avg' without cluster_set (constant-reciprocal kernel, no inv input)
    mod_avg = ConsensusModule("avg", dim=1)
    out_avg = jax.block_until_ready(mod_avg(x))
    ref_avg = jnp.mean(x, axis=1, keepdims=True)
    assert out_avg.shape == (N, 1, C)
    assert jnp.allclose(out_avg, ref_avg, atol=1e-5, rtol=1e-5)

    # 'avg' with cluster_set (per-batch divisor kernel)
    out_cl = jax.block_until_ready(mod_avg(x, cluster_set=cluster_set))
    ref_cl = jnp.sum(x, axis=1, keepdims=True) / cluster_set[:, :, None]
    assert out_cl.shape == (N, 1, C)
    assert jnp.allclose(out_cl, ref_cl, atol=1e-5, rtol=1e-5)

    # 'identity' / 'rnn' passthrough
    mod_id = ConsensusModule("rnn", dim=1)  # maps to identity
    out_id = jax.block_until_ready(mod_id(x))
    assert jnp.array_equal(out_id, x)

    # --- exercise the blocked-N / partial-last-block path explicitly ---
    N2, T2, C2 = 20, 8, 128
    x2 = jax.random.normal(k3, (N2, T2, C2), dtype=jnp.float32)
    out2 = jax.block_until_ready(
        segment_consensus(x2, "avg", cluster_set=None, block_n=8)  # grid=3, last block partial
    )
    ref2 = jnp.mean(x2, axis=1, keepdims=True)
    assert out2.shape == (N2, 1, C2)
    assert jnp.allclose(out2, ref2, atol=1e-5, rtol=1e-5)

    # --- auto block picker on the same shape (uses padded-footprint sizing) ---
    out3 = jax.block_until_ready(segment_consensus(x2, "avg", cluster_set=None))
    assert jnp.allclose(out3, ref2, atol=1e-5, rtol=1e-5)

    print("KERNEL_OK")
</pallas_src>

<mosaic_0001>
module attributes {stable_mosaic.version = 11 : i64} {
  func.func @_mean_kernel(%arg0: i32, %arg1: memref<2x8x32xf32, #tpu.memory_space<vmem>>, %arg2: memref<2x32xf32, #tpu.memory_space<vmem>>) attributes {dimension_semantics = [#tpu.dimension_semantics<parallel>], iteration_bounds = array<i64: 1>, scalar_prefetch = 0 : i64, scratch_operands = 0 : i64, tpu.core_type = #tpu.core_type<tc>, window_params = [{transform_indices = @transform_0, window_bounds = array<i64: 2, 8, 32>}, {transform_indices = @transform_1, window_bounds = array<i64: 2, 32>}]} {
    %c0 = arith.constant 0 : index
    %c0_0 = arith.constant 0 : index
    %c0_1 = arith.constant 0 : index
    %0 = vector.load %arg1[%c0, %c0_0, %c0_1] : memref<2x8x32xf32, #tpu.memory_space<vmem>>, vector<2x8x32xf32>
    %cst = arith.constant dense<0.000000e+00> : vector<2x32xf32>
    %1 = vector.multi_reduction <add>, %0, %cst [1] : vector<2x8x32xf32> to vector<2x32xf32>
    %cst_2 = arith.constant 1.250000e-01 : f32
    %2 = vector.broadcast %cst_2 : f32 to vector<2x32xf32>
    %3 = arith.mulf %1, %2 : vector<2x32xf32>
    %c0_3 = arith.constant 0 : index
    %c0_4 = arith.constant 0 : index
    %4 = vector.load %arg2[%c0_3, %c0_4] : memref<2x32xf32, #tpu.memory_space<vmem>>, vector<2x32xf32>
    tpu.vector_store %arg2[%c0_3, %c0_4], %3 {strides = array<i32>} : memref<2x32xf32, #tpu.memory_space<vmem>>, vector<2x32xf32>,
    return
  }
  func.func @transform_0(%arg0: i32) -> (i32, i32, i32) {
    %c0_i32 = arith.constant 0 : i32
    %c0_i32_0 = arith.constant 0 : i32
    %c0_i32_1 = arith.constant 0 : i32
    return %arg0, %c0_i32, %c0_i32_0 : i32, i32, i32
  }
  func.func @transform_1(%arg0: i32) -> (i32, i32) {
    %c0_i32 = arith.constant 0 : i32
    %c0_i32_0 = arith.constant 0 : i32
    return %arg0, %c0_i32 : i32, i32
  }
}

</mosaic_0001>

<bundles_post_ra>
// kernel: tpu_custom_call.1
= control target key start
LH: loop header
LB: loop body
LE: loop exit
PB: predicated region body
PF: predicated region fallthrough
CT: control target
= control target key end

     0   :  { %6 = vsyncpa [#allocation3], 0  ;;  %s144_s0 = inlined_call_operand.hbm [shape: f32[2,8,32], index: 0, kind: input, shape index: {}]   ;;  %s145_s1 = inlined_call_operand.hbm [shape: f32[2,32], index: 1, kind: output, shape index: {}]  }
   0x1   :  { %7 = vsyncpa [#allocation4], 0  ;;  %s12_s8 = sshll.u32 %s144_s0, 4  ;;  %s124_s9 = smov [#allocation2]   ;;  %s13_s8 = int_to_ptr.hbm [resolvable:$true] %s12_s8 }
   0x2   :  { %s14_s10 = sshll.u32 %s124_s9, 4  ;;  %s125_s11 = smov 128   ;;  %s15_s10 = int_to_ptr.vmem [resolvable:$true] %s14_s10 }
   0x3   :  { %s126_s12 = smov 8  }
   0x4   :  { %20 = dma.hbm_to_vmem [thread:$0]  %s13_s8, 256, %s15_s10, [#allocation3], %s125_s11, %s125_s11, %s126_s12  }
   0x5   :  { %120 = dma.done.wait [#allocation3], 256  }
   0x6   :  { %121 = vsyncadd [#allocation3], 4294967040  ;;  %vm27_vm0 = vcmask 261120   ;;  %v25_v0 = vld [vmem:[#allocation2] sm:$0xff]  ;;  %v26_v1 = vld [vmem:[#allocation2 + $0x8] sm:$0xff]  ;;  %s127_s0 = smov [#allocation5]  }
   0x7   :  { %v28_v2 = vsel %vm27_vm0, %v25_v0, 0.0  ;;  %v35_v3 = vsel %vm27_vm0, %v26_v1, 0.0  ;;  %s56_s13 = sshll.u32 %s127_s0, 4  ;;  %s58_s16 = sshll.u32 %s145_s1, 4  ;;  %vm46_vm1 = vcmask 1041409   ;;  %vm49_vm2 = vcmask 254976   ;;  %s57_s13 = int_to_ptr.vmem [resolvable:$true] %s56_s13  ;;  %s59_s16 = int_to_ptr.hbm [resolvable:$true] %s58_s16 }
   0x8   :  { %v29_v4 = vrot.slane %v28_v2, 4  ;;  %v36_v5 = vrot.slane %v35_v3, 4 }
   0xa   :  { %v30_v6 = vadd.f32 %v29_v4, %v28_v2  ;;  %v37_v7 = vadd.f32 %v36_v5, %v35_v3 }
   0xc   :  { %v31_v8 = vrot.slane %v30_v6, 2  ;;  %v38_v9 = vrot.slane %v37_v7, 2 }
   0xe   :  { %v32_v10 = vadd.f32 %v31_v8, %v30_v6  ;;  %v39_v11 = vadd.f32 %v38_v9, %v37_v7 }
  0x10   :  { %v33_v12 = vrot.slane %v32_v10, 1  ;;  %v40_v13 = vrot.slane %v39_v11, 1 }
  0x12   :  { %v34_v14 = vadd.f32 %v33_v12, %v32_v10  ;;  %v41_v15 = vadd.f32 %v40_v13, %v39_v11 }
  0x14   :  { %v42_v16 = vmul.f32 0.125, %v34_v14  ;;  %v43_v17 = vmul.f32 0.125, %v41_v15 }
  0x16   :  { %v47_v18 = vsel %vm46_vm1, %v43_v17, %v42_v16 }
  0x17   :  { %50 = vst.msk [vmem:[#allocation5] sm:$0x3] %vm49_vm2, %v47_v18 }
  0x18   :  { %61 = dma.vmem_to_hbm [thread:$0]  %s57_s13, 32, %s59_s16, [#allocation4]  }
  0x19   :  { %122 = dma.done.wait [#allocation4], 32  }
  0x1a   :  { %123 = vsyncadd [#allocation4], 4294967264 }
  0x1b   :  { %66 = vsyncpa [#allocation3], 1 }
  0x1c   :  { %67 = vsyncpa [#allocation4], 1 }

</bundles_post_ra>
